<compile_context>
chip_gen: v6e
topology: v6e:2x2x1
jax: 0.10.0
libtpu: 0.0.40
codegen_flags: <defaults>
</compile_context>

<pallas_src>
import jax
import jax.numpy as jnp
from jax.experimental import pallas as pl
from jax.experimental.pallas import tpu as pltpu

LANE = 128


# ------------------------------ small helpers --------------------------------

def _round_up(x, m):
    return ((x + m - 1) // m) * m


def _vmem_capacity_bytes():
    """Physical VMEM of the current chip generation (conservative fallback)."""
    try:
        info = pltpu.get_tpu_info()
        for name in ("vmem_capacity_bytes", "vmem_bytes", "vmem_size_bytes"):
            v = getattr(info, name, None)
            if v:
                return int(v)
    except Exception:
        pass
    return 64 * 2**20        # safe for v7x (64 MiB per TC); v5e/v6e have 128 MiB


def _vmem_bytes(B, TL, HB, Cin, Cout, f_max, pool, act_bytes, w_bytes):
    """Estimated per-step VMEM working set, including in-kernel temporaries."""
    db_in = 2 * B * (TL + HB) * Cin * act_bytes                  # double-buffered acts
    db_in += 2 * (f_max * Cin * Cout * w_bytes + Cout * 4)       # weights + bias
    db_out = 2 * (B * Cout * 4 if pool else B * TL * Cout * act_bytes)
    scratch = B * Cout * 4 if pool else 0
    tmp = B * (TL + max(f_max - 1, 0)) * Cin * act_bytes         # x_ext
    tmp += 2 * B * TL * Cin * act_bytes                          # live tap-slice copies
    tmp += 2 * B * TL * Cout * 4                                 # f32 acc + epilogue
    return db_in + db_out + scratch + tmp


def _choose_time_tile(B, L, Cin, Cout, f_max, HB, pool, budget, act_bytes, w_bytes):
    """Largest time tile (multiple of HB, divides L) whose working set fits budget."""
    if L % HB != 0:
        # TODO(synk): ragged sequence lengths fall back to a single full-length tile.
        return L
    cands = [tl for tl in range(HB, L + 1, HB) if L % tl == 0]
    for tl in sorted(cands, reverse=True):
        if _vmem_bytes(B, tl, HB, Cin, Cout, f_max, pool, act_bytes, w_bytes) <= budget:
            return tl
    return cands[0]


# ------------------------------- Pallas kernels -------------------------------

def _conv_relu_tile(xc_ref, xh_ref, w_ref, b_ref, f_max, is_first):
    """ReLU(bias + causal_conv(tile)).  Returns an f32 (B, TL, Cout) tile."""
    x = xc_ref[...]                                   # (B, TL, Cin) compute dtype
    B, TL, Cin = x.shape
    Cout = w_ref.shape[2]

    if f_max > 1:
        if xh_ref is None:                            # single-tile layer: pure left pad
            halo = jnp.zeros((B, f_max - 1, Cin), x.dtype)
        else:
            hb = xh_ref.shape[1]
            halo = xh_ref[:, hb - (f_max - 1):, :]    # last f_max-1 rows of prev tile
            keep = jnp.logical_not(is_first).astype(x.dtype)
            halo = halo * keep                        # causal zero padding on tile 0
        x_ext = jnp.concatenate([halo, x], axis=1)    # (B, TL + f_max - 1, Cin)

    # One big-M matmul per tap, accumulated in f32 (no f_max-wide lane concat).
    M = B * TL
    acc = jnp.dot(x.reshape(M, Cin), w_ref[f_max - 1],
                  preferred_element_type=jnp.float32)         # newest tap == x itself
    for k in range(f_max - 1):
        xs = x_ext[:, k:k + TL, :].reshape(M, Cin)
        acc = acc + jnp.dot(xs, w_ref[k], preferred_element_type=jnp.float32)

    y = acc + b_ref[...].astype(jnp.float32)                  # (M,Cout) + (1,Cout)
    return jnp.maximum(y, 0.0).reshape(B, TL, Cout)


def _make_conv_layer_kernel(*, f_max, use_halo, pool, split):
    """Fused multi-branch causal conv + bias + ReLU (+ optional max-over-time)."""

    def kernel(*refs):
        if use_halo:
            xc_ref, xh_ref = refs[0], refs[1]
            rest = refs[2:]
        else:
            xc_ref, xh_ref = refs[0], None
            rest = refs[1:]
        w_ref, b_ref = rest[0], rest[1]
        o_ref = rest[2]
        acc_ref = rest[3] if pool else None

        if split:                                     # (core, time) grid
            c, i = pl.program_id(0), pl.program_id(1)
            is_first = jnp.logical_and(c == 0, i == 0)
            inner_last = pl.num_programs(1) - 1
        else:
            i = pl.program_id(0)
            is_first = i == 0
            inner_last = pl.num_programs(0) - 1

        y = _conv_relu_tile(xc_ref, xh_ref, w_ref, b_ref, f_max, is_first)

        if not pool:
            o_ref[...] = y.astype(o_ref.dtype)
            return

        tile_max = jnp.max(y, axis=1)                 # (B, Cout) f32

        @pl.when(i == 0)
        def _():
            acc_ref[...] = tile_max

        @pl.when(i > 0)
        def _():
            acc_ref[...] = jnp.maximum(acc_ref[...], tile_max)

        @pl.when(i == inner_last)
        def _():
            if split:
                o_ref[...] = acc_ref[...][None].astype(o_ref.dtype)
            else:
                o_ref[...] = acc_ref[...].astype(o_ref.dtype)

    return kernel


# ------------------------------- layer wrapper --------------------------------

def _fused_causal_conv_layer(x_blc, w_fused, b_fused, *, pool, time_tile=None):
    """One TextCNN layer (all filter branches fused) as a single pallas_call.

    x_blc:   (B, L, Cin_pad)            activations, channels lane-padded
    w_fused: (f_max, Cin_pad, Cout_pad) tap-left-zero-padded, branch-concatenated
    b_fused: (1, Cout_pad) f32
    pool:    True  -> (B, Cout_pad) or (2, B, Cout_pad) per-core partial maxima (f32)
             False -> (B, L, Cout_pad) in the activation dtype
    """
    B, L, Cin = x_blc.shape
    f_max, _, Cout = w_fused.shape
    act_bytes = jnp.dtype(x_blc.dtype).itemsize
    w_bytes = jnp.dtype(w_fused.dtype).itemsize

    # Generation-aware VMEM budget (v7x: 64 MiB physical -> 48 MiB limit,
    # v5e/v6e: 128 MiB -> 96 MiB limit).
    cap = _vmem_capacity_bytes()
    vmem_limit = int(min(cap * 3 // 4, 100 * 2**20))
    budget = int(vmem_limit * 0.85)

    HB = 8 * -(-max(f_max - 1, 1) // 8)               # halo rows, multiple of 8

    TL = None
    if time_tile is not None and L % HB == 0 and \
            time_tile % HB == 0 and L % time_tile == 0:
        TL = time_tile                                # explicit override (tests)
    if TL is None:
        TL = _choose_time_tile(B, L, Cin, Cout, f_max, HB, pool, budget,
                               act_bytes, w_bytes)
    n_tiles = L // TL if L % TL == 0 else 1
    if n_tiles == 1:
        TL = L
    use_halo = f_max > 1 and n_tiles > 1              # single tile: halo is all zeros
    # Split the pooled time reduction across the two v7x TensorCores.
    split = pool and n_tiles >= 2 and n_tiles % 2 == 0
    half = n_tiles // 2
    r = TL // HB if use_halo else 1

    kernel = _make_conv_layer_kernel(f_max=f_max, use_halo=use_halo,
                                     pool=pool, split=split)

    if split:
        grid = (2, half)
        cur_spec = pl.BlockSpec((B, TL, Cin), lambda c, i: (0, c * half + i, 0))
        halo_spec = pl.BlockSpec(
            (B, HB, Cin),
            lambda c, i: (0, jnp.maximum((c * half + i) * r - 1, 0), 0))
        w_spec = pl.BlockSpec((f_max, Cin, Cout), lambda c, i: (0, 0, 0))
        b_spec = pl.BlockSpec((1, Cout), lambda c, i: (0, 0))
        out_spec = pl.BlockSpec((1, B, Cout), lambda c, i: (c, 0, 0))
        out_shape = jax.ShapeDtypeStruct((2, B, Cout), jnp.float32)
        semantics = ("parallel", "arbitrary")
    else:
        grid = (n_tiles,)
        cur_spec = pl.BlockSpec((B, TL, Cin), lambda i: (0, i, 0))
        halo_spec = pl.BlockSpec(
            (B, HB, Cin), lambda i: (0, jnp.maximum(i * r - 1, 0), 0))
        w_spec = pl.BlockSpec((f_max, Cin, Cout), lambda i: (0, 0, 0))
        b_spec = pl.BlockSpec((1, Cout), lambda i: (0, 0))
        if pool:
            out_spec = pl.BlockSpec((B, Cout), lambda i: (0, 0))
            out_shape = jax.ShapeDtypeStruct((B, Cout), jnp.float32)
            semantics = ("arbitrary",)                # time axis is a reduction
        else:
            out_spec = pl.BlockSpec((B, TL, Cout), lambda i: (0, i, 0))
            out_shape = jax.ShapeDtypeStruct((B, L, Cout), x_blc.dtype)
            semantics = ("parallel",)                 # independent time tiles

    in_specs = [cur_spec] + ([halo_spec] if use_halo else []) + [w_spec, b_spec]
    inputs = (x_blc,) + ((x_blc,) if use_halo else ()) + (w_fused, b_fused)
    scratch = [pltpu.VMEM((B, Cout), jnp.float32)] if pool else []

    # TODO(synk): set pipeline_mode=pl.Buffered(3) on cur_spec only if a profile
    # still shows exposed DMA on the activation stream after the larger tiles.
    return pl.pallas_call(
        kernel,
        out_shape=out_shape,
        grid=grid,
        in_specs=in_specs,
        out_specs=out_spec,
        scratch_shapes=scratch,
        compiler_params=pltpu.CompilerParams(
            dimension_semantics=semantics,
            vmem_limit_bytes=vmem_limit),
    )(*inputs)


# --------------------------- parameters / forward -----------------------------

def init_textcnn_params(key, emb_dim, num_layers, filters, filter_num):
    """Deterministic init; weights in PyTorch Conv1d layout (Cout, Cin, f)."""
    params = []
    for l in range(num_layers):
        in_ch = emb_dim if l == 0 else filter_num * len(filters)
        convs = []
        for f in filters:
            key, kw, kb = jax.random.split(key, 3)
            bound = 1.0 / float(in_ch * f) ** 0.5
            w = jax.random.uniform(kw, (filter_num, in_ch, f), jnp.float32, -bound, bound)
            b = jax.random.uniform(kb, (filter_num,), jnp.float32, -bound, bound)
            convs.append((w, b))
        params.append(convs)
    return params


def fuse_textcnn_params(params, compute_dtype=jnp.bfloat16):
    """Hoisted preprocessing (not per-forward): per layer, transpose weights to
    (f, Cin, Cout), left-zero-pad taps to f_max, concat branches along Cout in
    `filters` order (matches torch.cat(next_activ, 1)), then lane-pad Cin/Cout
    to multiples of 128 and cast to the compute dtype."""
    fused = []
    for convs in params:
        f_max = max(w.shape[2] for (w, _) in convs)
        ws, bs = [], []
        for (w, b) in convs:
            f = w.shape[2]
            w_fio = jnp.transpose(w, (2, 1, 0))                       # (f, Cin, Cout_b)
            w_fio = jnp.pad(w_fio, ((f_max - f, 0), (0, 0), (0, 0)))  # zero early taps
            ws.append(w_fio)
            bs.append(b)
        w_all = jnp.concatenate(ws, axis=2)                           # (f_max, Cin, Ctot)
        b_all = jnp.concatenate(bs, axis=0)
        cin, ctot = w_all.shape[1], w_all.shape[2]
        cin_p, cout_p = _round_up(cin, LANE), _round_up(ctot, LANE)
        w_all = jnp.pad(w_all, ((0, 0), (0, cin_p - cin), (0, cout_p - ctot)))
        b_all = jnp.pad(b_all, ((0, cout_p - ctot),))
        fused.append({"w": w_all.astype(compute_dtype),
                      "b": b_all.reshape(1, cout_p).astype(jnp.float32),
                      "cout": ctot})
    return fused


def textcnn_forward(x_ncl, fused_params, max_pool=True,
                    compute_dtype=jnp.bfloat16, time_tile=None):
    """Matches TextCNN.forward.  x_ncl: (B, emb, L) as in PyTorch (NCL)."""
    # TODO(synk): fuse adjacent layers into one pallas_call (intermediate kept in
    # VMEM) when (B, L, Cout_pad) fits the per-generation VMEM budget.
    B, C, L = x_ncl.shape
    act = jnp.transpose(x_ncl, (0, 2, 1))                             # NCL -> (B, L, C)
    cin_pad = fused_params[0]["w"].shape[1]
    if cin_pad > C:
        act = jnp.pad(act, ((0, 0), (0, 0), (0, cin_pad - C)))        # lane-pad emb dim
    act = act.astype(compute_dtype)

    n = len(fused_params)
    for li, p in enumerate(fused_params):
        if max_pool and li == n - 1:
            # ReLU-after-concat == ReLU-per-fused-branch; max-pool fused in-kernel.
            out = _fused_causal_conv_layer(act, p["w"], p["b"], pool=True,
                                           time_tile=time_tile)
            if out.ndim == 3:                                         # per-TC partials
                out = jnp.maximum(out[0], out[1])
            return out[:, :p["cout"]].astype(jnp.float32)
        act = _fused_causal_conv_layer(act, p["w"], p["b"], pool=False,
                                       time_tile=time_tile)
    out = act[:, :, :fused_params[-1]["cout"]].astype(jnp.float32)
    return jnp.transpose(out, (0, 2, 1))                              # back to (B,Ctot,L)


# ----------------------------- pure-JAX reference -----------------------------

def reference_forward(x_ncl, params, max_pool=True):
    act = x_ncl                                                       # (B, C, L)
    L = x_ncl.shape[2]
    for convs in params:
        outs = []
        for (w, b) in convs:
            f = w.shape[2]
            xp = jnp.pad(act, ((0, 0), (0, 0), (f - 1, 0)))
            y = b[None, :, None]
            for k in range(f):
                y = y + jnp.einsum('oi,bit->bot', w[:, :, k], xp[:, :, k:k + L])
            outs.append(y)
        act = jax.nn.relu(jnp.concatenate(outs, axis=1))
    if max_pool:
        return jnp.max(act, axis=2)
    return act


# ------------------------------------ main ------------------------------------

if __name__ == "__main__":
    B, emb_dim, L = 2, 16, 16
    num_layers, filters, filter_num = 2, (2, 3), 8

    key = jax.random.PRNGKey(0)
    kx, kp = jax.random.split(key)
    x = jax.random.normal(kx, (B, emb_dim, L), jnp.float32)           # PyTorch NCL input
    params = init_textcnn_params(kp, emb_dim, num_layers, filters, filter_num)
    ctot = filter_num * len(filters)

    # f32 compute path: tight numerical check (single-tile pooled / non-pooled).
    fused_f32 = fuse_textcnn_params(params, compute_dtype=jnp.float32)
    out = jax.block_until_ready(
        textcnn_forward(x, fused_f32, max_pool=True, compute_dtype=jnp.float32))
    ref = reference_forward(x, params, max_pool=True)
    assert out.shape == (B, ctot), out.shape
    assert jnp.allclose(out, ref, atol=1e-4, rtol=1e-4), "pool mismatch (f32)"

    out_np = jax.block_until_ready(
        textcnn_forward(x, fused_f32, max_pool=False, compute_dtype=jnp.float32))
    ref_np = reference_forward(x, params, max_pool=False)
    assert out_np.shape == ref_np.shape
    assert jnp.allclose(out_np, ref_np, atol=1e-4, rtol=1e-4), "no-pool mismatch (f32)"

    # Multi-tile paths: halo DMA, "parallel" time grid and the 2-core split pooled
    # reduction, forced via a small time tile on a longer sequence.
    L2 = 64
    x2 = jax.random.normal(jax.random.PRNGKey(1), (B, emb_dim, L2), jnp.float32)
    out2 = jax.block_until_ready(
        textcnn_forward(x2, fused_f32, max_pool=True, compute_dtype=jnp.float32,
                        time_tile=8))
    ref2 = reference_forward(x2, params, max_pool=True)
    assert jnp.allclose(out2, ref2, atol=1e-4, rtol=1e-4), "split-pool mismatch"

    out2_np = jax.block_until_ready(
        textcnn_forward(x2, fused_f32, max_pool=False, compute_dtype=jnp.float32,
                        time_tile=16))
    ref2_np = reference_forward(x2, params, max_pool=False)
    assert jnp.allclose(out2_np, ref2_np, atol=1e-4, rtol=1e-4), "tiled no-pool mismatch"

    # bf16 compute path (production dtype): looser tolerance.
    fused_bf16 = fuse_textcnn_params(params)                          # bf16 weights
    out_bf = jax.block_until_ready(textcnn_forward(x, fused_bf16, max_pool=True))
    assert jnp.allclose(out_bf, ref, atol=5e-2, rtol=5e-2), "pool mismatch (bf16)"

    print("KERNEL_OK")
</pallas_src>

<mosaic_0001>
module attributes {stable_mosaic.version = 11 : i64} {
  func.func @kernel(%arg0: i32, %arg1: memref<2x16x128xf32, #tpu.memory_space<vmem>>, %arg2: memref<3x128x128xf32, #tpu.memory_space<vmem>>, %arg3: memref<1x128xf32, #tpu.memory_space<vmem>>, %arg4: memref<2x16x128xf32, #tpu.memory_space<vmem>>) attributes {dimension_semantics = [#tpu.dimension_semantics<parallel>], iteration_bounds = array<i64: 1>, scalar_prefetch = 0 : i64, scratch_operands = 0 : i64, tpu.core_type = #tpu.core_type<tc>, window_params = [{transform_indices = @transform_0, window_bounds = array<i64: 2, 16, 128>}, {pipeline_mode = #tpu.pipeline_mode<synchronous>, transform_indices = @transform_1, window_bounds = array<i64: 3, 128, 128>}, {pipeline_mode = #tpu.pipeline_mode<synchronous>, transform_indices = @transform_2, window_bounds = array<i64: 1, 128>}, {transform_indices = @transform_3, window_bounds = array<i64: 2, 16, 128>}]} {
    %c0 = arith.constant 0 : index
    %c0_0 = arith.constant 0 : index
    %c0_1 = arith.constant 0 : index
    %0 = vector.load %arg1[%c0, %c0_0, %c0_1] : memref<2x16x128xf32, #tpu.memory_space<vmem>>, vector<2x16x128xf32>
    %cst = arith.constant 0.000000e+00 : f32
    %1 = vector.broadcast %cst : f32 to vector<2x2x128xf32>
    %2 = tpu.concatenate %1, %0 in 1 : vector<2x2x128xf32>, vector<2x16x128xf32> -> vector<2x18x128xf32>
    %3 = vector.shape_cast %0 : vector<2x16x128xf32> to vector<32x128xf32>
    %c2 = arith.constant 2 : index
    %c0_2 = arith.constant 0 : index
    %c0_3 = arith.constant 0 : index
    %4 = vector.load %arg2[%c2, %c0_2, %c0_3] : memref<3x128x128xf32, #tpu.memory_space<vmem>>, vector<1x128x128xf32>
    %5 = vector.shape_cast %4 : vector<1x128x128xf32> to vector<128x128xf32>
    %cst_4 = arith.constant dense<0.000000e+00> : vector<32x128xf32>
    %6 = tpu.matmul %3, %5, %cst_4 {dimension_numbers = #tpu.dot_dimension_numbers<[1], [0], [0], [1], [0, 0, 1, 1], [], []>} : vector<32x128xf32>, vector<128x128xf32>, vector<32x128xf32> -> vector<32x128xf32>
    %7 = vector.extract_strided_slice %2 {offsets = [0, 0, 0], sizes = [2, 16, 128], strides = [1, 1, 1]} : vector<2x18x128xf32> to vector<2x16x128xf32>
    %8 = vector.shape_cast %7 : vector<2x16x128xf32> to vector<32x128xf32>
    %c0_5 = arith.constant 0 : index
    %c0_6 = arith.constant 0 : index
    %c0_7 = arith.constant 0 : index
    %9 = vector.load %arg2[%c0_5, %c0_6, %c0_7] : memref<3x128x128xf32, #tpu.memory_space<vmem>>, vector<1x128x128xf32>
    %10 = vector.shape_cast %9 : vector<1x128x128xf32> to vector<128x128xf32>
    %cst_8 = arith.constant dense<0.000000e+00> : vector<32x128xf32>
    %11 = tpu.matmul %8, %10, %cst_8 {dimension_numbers = #tpu.dot_dimension_numbers<[1], [0], [0], [1], [0, 0, 1, 1], [], []>} : vector<32x128xf32>, vector<128x128xf32>, vector<32x128xf32> -> vector<32x128xf32>
    %12 = arith.addf %6, %11 : vector<32x128xf32>
    %13 = vector.extract_strided_slice %2 {offsets = [0, 1, 0], sizes = [2, 16, 128], strides = [1, 1, 1]} : vector<2x18x128xf32> to vector<2x16x128xf32>
    %14 = vector.shape_cast %13 : vector<2x16x128xf32> to vector<32x128xf32>
    %c1 = arith.constant 1 : index
    %c0_9 = arith.constant 0 : index
    %c0_10 = arith.constant 0 : index
    %15 = vector.load %arg2[%c1, %c0_9, %c0_10] : memref<3x128x128xf32, #tpu.memory_space<vmem>>, vector<1x128x128xf32>
    %16 = vector.shape_cast %15 : vector<1x128x128xf32> to vector<128x128xf32>
    %cst_11 = arith.constant dense<0.000000e+00> : vector<32x128xf32>
    %17 = tpu.matmul %14, %16, %cst_11 {dimension_numbers = #tpu.dot_dimension_numbers<[1], [0], [0], [1], [0, 0, 1, 1], [], []>} : vector<32x128xf32>, vector<128x128xf32>, vector<32x128xf32> -> vector<32x128xf32>
    %18 = arith.addf %12, %17 : vector<32x128xf32>
    %c0_12 = arith.constant 0 : index
    %c0_13 = arith.constant 0 : index
    %19 = vector.load %arg3[%c0_12, %c0_13] : memref<1x128xf32, #tpu.memory_space<vmem>>, vector<1x128xf32>
    %20 = vector.broadcast %19 : vector<1x128xf32> to vector<32x128xf32>
    %21 = arith.addf %18, %20 : vector<32x128xf32>
    %cst_14 = arith.constant 0.000000e+00 : f32
    %22 = vector.broadcast %cst_14 : f32 to vector<32x128xf32>
    %23 = arith.maximumf %21, %22 : vector<32x128xf32>
    %24 = vector.shape_cast %23 : vector<32x128xf32> to vector<2x16x128xf32>
    %c0_15 = arith.constant 0 : index
    %c0_16 = arith.constant 0 : index
    %c0_17 = arith.constant 0 : index
    %25 = vector.load %arg4[%c0_15, %c0_16, %c0_17] : memref<2x16x128xf32, #tpu.memory_space<vmem>>, vector<2x16x128xf32>
    tpu.vector_store %arg4[%c0_15, %c0_16, %c0_17], %24 {strides = array<i32>} : memref<2x16x128xf32, #tpu.memory_space<vmem>>, vector<2x16x128xf32>,
    return
  }
  func.func @transform_0(%arg0: i32) -> (i32, i32, i32) {
    %c0_i32 = arith.constant 0 : i32
    %c0_i32_0 = arith.constant 0 : i32
    %c0_i32_1 = arith.constant 0 : i32
    return %c0_i32, %arg0, %c0_i32_0 : i32, i32, i32
  }
  func.func @transform_1(%arg0: i32) -> (i32, i32, i32) {
    %c0_i32 = arith.constant 0 : i32
    %c0_i32_0 = arith.constant 0 : i32
    %c0_i32_1 = arith.constant 0 : i32
    %c0_i32_2 = arith.constant 0 : i32
    return %c0_i32, %c0_i32_0, %c0_i32_1 : i32, i32, i32
  }
  func.func @transform_2(%arg0: i32) -> (i32, i32) {
    %c0_i32 = arith.constant 0 : i32
    %c0_i32_0 = arith.constant 0 : i32
    %c0_i32_1 = arith.constant 0 : i32
    return %c0_i32, %c0_i32_0 : i32, i32
  }
  func.func @transform_3(%arg0: i32) -> (i32, i32, i32) {
    %c0_i32 = arith.constant 0 : i32
    %c0_i32_0 = arith.constant 0 : i32
    %c0_i32_1 = arith.constant 0 : i32
    return %c0_i32, %arg0, %c0_i32_0 : i32, i32, i32
  }
}

</mosaic_0001>

<bundles_post_ra>
// kernel: tpu_custom_call.1
= control target key start
LH: loop header
LB: loop body
LE: loop exit
PB: predicated region body
PF: predicated region fallthrough
CT: control target
= control target key end

     0   :  { %8 = vsyncpa [#allocation3], 0  ;;  %s785_s0 = inlined_call_operand.hbm [shape: f32[2,16,128], index: 0, kind: input, shape index: {}]   ;;  %s786_s1 = inlined_call_operand.hbm [shape: f32[3,128,128], index: 1, kind: input, shape index: {}]   ;;  %s787_s2 = inlined_call_operand.vmem [shape: f32[1,128], index: 2, kind: input, shape index: {}]   ;;  %s788_s3 = inlined_call_operand.hbm [shape: f32[2,16,128], index: 3, kind: output, shape index: {}]  }
   0x1   :  { %9 = vsyncpa [#allocation6], 0 }
   0x2   :  { %10 = vsyncpa [#allocation4], 0  ;;  %s709_s12 = smov [#allocation2]  }
   0x3   :  { %s16_s13 = sshll.u32 %s709_s12, 4  ;;  %s17_s13 = int_to_ptr.vmem [resolvable:$true] %s16_s13 }
   0x4   :  { %s651_s14 = scalar_lea.vmem %s17_s13, 512  ;;  %p656_p1 = scmp.lt.s32.totalorder %s17_s13, %s17_s13 }
   0x5   :  { %p652_p0 = scmp.ne.s32.totalorder %s17_s13, %s651_s14  ;;  %p657_p2 = scmp.lt.s32.totalorder %s651_s14, %s651_s14 }
   0x7   :  { %p658_p3 = por %p657_p2, %p656_p1 }
   0x9   :  { %p659_p4 = pnand %p658_p3, %p652_p0 }
   0xb   :  { %662 = shalt.err (!%p659_p4)
}
   0xc   :  { %s710_s15 = smov 128   ;;  %s711_s16 = smov 8  }
   0xd   :  { %22 = dma.hbm_to_vmem [thread:$0]  %s785_s0, 512, %s17_s13, [#allocation3], %s710_s15, %s710_s15, %s711_s16  }
   0xe   :  { %s712_s19 = smov [#allocation5]  }
   0xf   :  { %s28_s20 = sshll.u32 %s712_s19, 4  ;;  %s29_s20 = int_to_ptr.vmem [resolvable:$true] %s28_s20 }
  0x10   :  { %s671_s21 = scalar_lea.vmem %s29_s20, 6144  ;;  %p676_p6 = scmp.lt.s32.totalorder %s29_s20, %s29_s20 }
  0x11   :  { %p672_p5 = scmp.ne.s32.totalorder %s29_s20, %s671_s21  ;;  %p677_p7 = scmp.lt.s32.totalorder %s671_s21, %s671_s21 }
  0x13   :  { %p678_p8 = por %p677_p7, %p676_p6 }
  0x15   :  { %p679_p9 = pnand %p678_p8, %p672_p5 }
  0x17   :  { %682 = shalt.err (!%p679_p9)
}
  0x18   :  { %34 = dma.hbm_to_vmem [thread:$0]  %s786_s1, 6144, %s29_s20, [#allocation6], %s710_s15, %s710_s15, %s711_s16  }
  0x19   :  { %703 = dma.done.wait [#allocation3], 512  }
  0x1a   :  { %704 = vsyncadd [#allocation3], 4294966784 }
  0x1b   :  { %705 = dma.done.wait [#allocation6], 6144  }
  0x1c   :  { %706 = vsyncadd [#allocation6], 4294961152  ;;  %v96_v0 = vld [vmem:[#allocation5 + $0x78] sm:$0xff]  ;;  %v95_v2 = vld [vmem:[#allocation5 + $0x70] sm:$0xff]  ;;  %vm51_vm0 = vcmask 1041408   ;;  %vm269_vm2 = vcmask 1046528  }
  0x1d   :  { %v80_v1 = vld [vmem:[#allocation5 + $0x178] sm:$0xff]  ;;  %492 = vmatprep.subr.mxu0 %v96_v0  ;;  %v79_v3 = vld [vmem:[#allocation5 + $0x170] sm:$0xff]  ;;  %v94_v4 = vld [vmem:[#allocation5 + $0x68] sm:$0xff]  ;;  %s713_s24 = smov [#allocation7]  }
  0x1e   :  { %530 = vmatprep.subr.mxu1 %v80_v1  ;;  %493 = vmatpush3.msra.mxu0 %v96_v0  ;;  %v78_v5 = vld [vmem:[#allocation5 + $0x168] sm:$0xff]  ;;  %v93_v6 = vld [vmem:[#allocation5 + $0x60] sm:$0xff]  ;;  %v92_v8 = vld [vmem:[#allocation5 + $0x58] sm:$0xff]  ;;  %s414_s25 = sshll.u32 %s713_s24, 4  ;;  %s415_s25 = int_to_ptr.vmem [resolvable:$true] %s414_s25 }
  0x1f   :  { %531 = vmatpush3.msra.mxu1 %v80_v1  ;;  %494 = vmatprep.subr.mxu0 %v95_v2  ;;  %v77_v7 = vld [vmem:[#allocation5 + $0x160] sm:$0xff]  ;;  %v76_v9 = vld [vmem:[#allocation5 + $0x158] sm:$0xff]  ;;  %v91_v10 = vld [vmem:[#allocation5 + $0x50] sm:$0xff]  ;;  %p688_p11 = scmp.lt.s32.totalorder %s415_s25, %s415_s25 }
  0x20   :  { %532 = vmatprep.subr.mxu1 %v79_v3  ;;  %495 = vmatpush3.msra.mxu0 %v95_v2  ;;  %v75_v11 = vld [vmem:[#allocation5 + $0x150] sm:$0xff]  ;;  %v90_v12 = vld [vmem:[#allocation5 + $0x48] sm:$0xff]  ;;  %v89_v14 = vld [vmem:[#allocation5 + $0x40] sm:$0xff] }
  0x21   :  { %533 = vmatpush3.msra.mxu1 %v79_v3  ;;  %496 = vmatprep.subr.mxu0 %v94_v4  ;;  %v74_v13 = vld [vmem:[#allocation5 + $0x148] sm:$0xff]  ;;  %v73_v15 = vld [vmem:[#allocation5 + $0x140] sm:$0xff]  ;;  %v88_v16 = vld [vmem:[#allocation5 + $0x38] sm:$0xff] }
  0x22   :  { %534 = vmatprep.subr.mxu1 %v78_v5  ;;  %497 = vmatpush3.msra.mxu0 %v94_v4  ;;  %v72_v17 = vld [vmem:[#allocation5 + $0x138] sm:$0xff]  ;;  %v87_v18 = vld [vmem:[#allocation5 + $0x30] sm:$0xff]  ;;  %v86_v20 = vld [vmem:[#allocation5 + $0x28] sm:$0xff] }
  0x23   :  { %535 = vmatpush3.msra.mxu1 %v78_v5  ;;  %498 = vmatprep.subr.mxu0 %v93_v6  ;;  %v71_v19 = vld [vmem:[#allocation5 + $0x130] sm:$0xff]  ;;  %v70_v21 = vld [vmem:[#allocation5 + $0x128] sm:$0xff]  ;;  %v85_v22 = vld [vmem:[#allocation5 + $0x20] sm:$0xff] }
  0x24   :  { %536 = vmatprep.subr.mxu1 %v77_v7  ;;  %499 = vmatpush3.msra.mxu0 %v93_v6  ;;  %v69_v23 = vld [vmem:[#allocation5 + $0x120] sm:$0xff]  ;;  %v84_v24 = vld [vmem:[#allocation5 + $0x18] sm:$0xff]  ;;  %v83_v26 = vld [vmem:[#allocation5 + $0x10] sm:$0xff] }
  0x25   :  { %537 = vmatpush3.msra.mxu1 %v77_v7  ;;  %500 = vmatprep.subr.mxu0 %v92_v8  ;;  %v68_v25 = vld [vmem:[#allocation5 + $0x118] sm:$0xff]  ;;  %v67_v27 = vld [vmem:[#allocation5 + $0x110] sm:$0xff]  ;;  %v43_v28 = vld [vmem:[#allocation2] sm:$0xff] }
  0x26   :  { %538 = vmatprep.subr.mxu1 %v76_v9  ;;  %501 = vmatpush3.msra.mxu0 %v92_v8  ;;  %v746_v29 = vld [vmem:[#allocation2 + $0x8] sm:$0xff]  ;;  %v748_v32 = vrot.slane %v43_v28, 6  ;;  %v81_v34 = vld [vmem:[#allocation5] sm:$0xff]  ;;  %vm752_vm1 = vmneg %vm51_vm0 }
  0x27   :  { %539 = vmatpush3.msra.mxu1 %v76_v9  ;;  %502 = vmatprep.subr.mxu0 %v91_v10  ;;  %v82_v30 = vld [vmem:[#allocation5 + $0x8] sm:$0xff]  ;;  %v53_v33 = vrot.slane %v746_v29, 6  ;;  %v65_v35 = vld [vmem:[#allocation5 + $0x100] sm:$0xff]  ;;  %v300_v38 = vld [vmem:[#allocation5 + $0xf8] sm:$0xff] }
  0x28   :  { %540 = vmatprep.subr.mxu1 %v75_v11  ;;  %503 = vmatpush3.msra.mxu0 %v91_v10  ;;  %v66_v31 = vld [vmem:[#allocation5 + $0x108] sm:$0xff]  ;;  %v299_v39 = vld [vmem:[#allocation5 + $0xf0] sm:$0xff]  ;;  %v297_v41 = vld [vmem:[#allocation5 + $0xe0] sm:$0xff]  ;;  %v62_v56 = vsel %vm51_vm0, 0.0, %v748_v32 }
  0x29   :  { %541 = vmatpush3.msra.mxu1 %v75_v11  ;;  %504 = vmatprep.subr.mxu0 %v90_v12  ;;  %v760_v37 = vsel %vm51_vm0, %v748_v32, %v53_v33  ;;  %v298_v40 = vld [vmem:[#allocation5 + $0xe8] sm:$0xff]  ;;  %v296_v42 = vld [vmem:[#allocation5 + $0xd8] sm:$0xff]  ;;  %v295_v43 = vld [vmem:[#allocation5 + $0xd0] sm:$0xff]  ;;  %v270_v62 = vrot.slane %v62_v56, 1  ;;  %v273_v0 = vrot.slane %v53_v33, 1 }
  0x2a   :  { %542 = vmatprep.subr.mxu1 %v74_v13  ;;  %505 = vmatpush3.msra.mxu0 %v90_v12  ;;  %v294_v44 = vld [vmem:[#allocation5 + $0xc8] sm:$0xff]  ;;  %v293_v45 = vld [vmem:[#allocation5 + $0xc0] sm:$0xff]  ;;  %v292_v46 = vld [vmem:[#allocation5 + $0xb8] sm:$0xff]  ;;  %v271_v59 = vrot.slane %v760_v37, 1 }
  0x2b   :  { %543 = vmatpush3.msra.mxu1 %v74_v13  ;;  %506 = vmatprep.subr.mxu0 %v89_v14  ;;  %v291_v47 = vld [vmem:[#allocation5 + $0xb0] sm:$0xff]  ;;  %v290_v48 = vld [vmem:[#allocation5 + $0xa8] sm:$0xff]  ;;  %v46_v50 = vld [vmem:[#allocation2 + $0x18] sm:$0xff] }
  0x2c   :  { %544 = vmatprep.subr.mxu1 %v73_v15  ;;  %507 = vmatpush3.msra.mxu0 %v89_v14  ;;  %v45_v49 = vld [vmem:[#allocation2 + $0x10] sm:$0xff]  ;;  %v289_v51 = vld [vmem:[#allocation5 + $0xa0] sm:$0xff]  ;;  %v56_v53 = vrot.slane %v46_v50, 6  ;;  %v288_v54 = vld [vmem:[#allocation5 + $0x98] sm:$0xff]  ;;  %v272_v3 = vsel %vm269_vm2, %v270_v62, %v271_v59  ;;  %v274_v5 = vsel %vm269_vm2, %v271_v59, %v273_v0 }
  0x2d   :  { %545 = vmatpush3.msra.mxu1 %v73_v15  ;;  %508 = vmatprep.subr.mxu0 %v88_v16  ;;  %v55_v52 = vrot.slane %v45_v49, 6  ;;  %v287_v58 = vld [vmem:[#allocation5 + $0x90] sm:$0xff]  ;;  %v286_v61 = vld [vmem:[#allocation5 + $0x88] sm:$0xff]  ;;  %v285_v2 = vld [vmem:[#allocation5 + $0x80] sm:$0xff] }
  0x2e   :  { %546 = vmatprep.subr.mxu1 %v72_v17  ;;  %509 = vmatpush3.msra.mxu0 %v88_v16  ;;  %v278_v1 = vrot.slane %v56_v53, 1 }
  0x2f   :  { %547 = vmatpush3.msra.mxu1 %v72_v17  ;;  %510 = vmatprep.subr.mxu0 %v87_v18  ;;  %v57_v55 = vsel %vm51_vm0, %v55_v52, %v56_v53  ;;  %v63_v57 = vsel %vm51_vm0, 0.0, %v55_v52 }
  0x30   :  { %548 = vmatprep.subr.mxu1 %v71_v19  ;;  %511 = vmatpush3.msra.mxu0 %v87_v18  ;;  %v276_v60 = vrot.slane %v57_v55, 1  ;;  %v275_v63 = vrot.slane %v63_v57, 1  ;;  %v431_v18 = vld [vmem:[%s787_s2] ss:$0 sm:$0xff]  ;;  %s683_s2 = scalar_lea.vmem %s415_s25, 512 }
  0x31   :  { %549 = vmatpush3.msra.mxu1 %v71_v19  ;;  %512 = vmatprep.subr.mxu0 %v86_v20  ;;  %p684_p10 = scmp.ne.s32.totalorder %s415_s25, %s683_s2  ;;  %p689_p12 = scmp.lt.s32.totalorder %s683_s2, %s683_s2 }
  0x32   :  { %550 = vmatprep.subr.mxu1 %v70_v21  ;;  %513 = vmatpush3.msra.mxu0 %v86_v20  ;;  %v277_v4 = vsel %vm269_vm2, %v275_v63, %v276_v60  ;;  %v279_v6 = vsel %vm269_vm2, %v276_v60, %v278_v1 }
  0x33   :  { %551 = vmatpush3.msra.mxu1 %v70_v21  ;;  %514 = vmatprep.subr.mxu0 %v85_v22  ;;  %p690_p13 = por %p689_p12, %p688_p11 }
  0x34   :  { %552 = vmatprep.subr.mxu1 %v69_v23  ;;  %515 = vmatpush3.msra.mxu0 %v85_v22 }
  0x35   :  { %553 = vmatpush3.msra.mxu1 %v69_v23  ;;  %516 = vmatprep.subr.mxu0 %v84_v24  ;;  %p691_p0 = pnand %p690_p13, %p684_p10 }
  0x36   :  { %554 = vmatprep.subr.mxu1 %v68_v25  ;;  %517 = vmatpush3.msra.mxu0 %v84_v24 }
  0x37   :  { %555 = vmatpush3.msra.mxu1 %v68_v25  ;;  %518 = vmatprep.subr.mxu0 %v83_v26 }
  0x38   :  { %556 = vmatprep.subr.mxu1 %v67_v27  ;;  %519 = vmatpush3.msra.mxu0 %v83_v26 }
  0x39   :  { %557 = vmatpush3.msra.mxu1 %v67_v27  ;;  %520 = vmatprep.subr.mxu0 %v82_v30 }
  0x3a   :  { %558 = vmatprep.subr.mxu1 %v66_v31  ;;  %521 = vmatpush3.msra.mxu0 %v82_v30 }
  0x3b   :  { %559 = vmatpush3.msra.mxu1 %v66_v31  ;;  %522 = vmatprep.subr.mxu0 %v81_v34 }
  0x3c   :  { %560 = vmatprep.subr.mxu1 %v65_v35  ;;  %523 = vmatpush3.msra.mxu0 %v81_v34 }
  0x3d   :  { %524 = vmatprep.mubr.msk.f32.mxu0 %vm752_vm1, %v748_v32  ;;  %561 = vmatpush3.msra.mxu1 %v65_v35 }
  0x3e   :  { %562 = vmatprep.mubr.f32.mxu1 %v43_v28  ;;  %525 = vmatmul.mubr.f32.vlgmr.msra.gmra.mxu0 %v760_v37 }
  0x3f   :  { %563 = vmatmul.mubr.f32.vlgmr.msra.gmra.mxu1 %v746_v29  ;;  %568 = vmatprep.subr.mxu0 %v300_v38 }
  0x40   :  { %606 = vmatprep.subr.mxu1 %v300_v38  ;;  %569 = vmatpush3.msra.mxu0 %v300_v38 }
  0x41   :  { %622 = vmatpush3.msra.mxu1 %v300_v38  ;;  %570 = vmatprep.subr.mxu0 %v299_v39 }
  0x42   :  { %607 = vmatprep.subr.mxu1 %v299_v39  ;;  %571 = vmatpush3.msra.mxu0 %v299_v39 }
  0x43   :  { %623 = vmatpush3.msra.mxu1 %v299_v39  ;;  %572 = vmatprep.subr.mxu0 %v298_v40 }
  0x44   :  { %608 = vmatprep.subr.mxu1 %v298_v40  ;;  %573 = vmatpush3.msra.mxu0 %v298_v40 }
  0x45   :  { %624 = vmatpush3.msra.mxu1 %v298_v40  ;;  %574 = vmatprep.subr.mxu0 %v297_v41 }
  0x46   :  { %609 = vmatprep.subr.mxu1 %v297_v41  ;;  %575 = vmatpush3.msra.mxu0 %v297_v41 }
  0x47   :  { %625 = vmatpush3.msra.mxu1 %v297_v41  ;;  %576 = vmatprep.subr.mxu0 %v296_v42 }
  0x48   :  { %610 = vmatprep.subr.mxu1 %v296_v42  ;;  %577 = vmatpush3.msra.mxu0 %v296_v42 }
  0x49   :  { %626 = vmatpush3.msra.mxu1 %v296_v42  ;;  %578 = vmatprep.subr.mxu0 %v295_v43 }
  0x4a   :  { %611 = vmatprep.subr.mxu1 %v295_v43  ;;  %579 = vmatpush3.msra.mxu0 %v295_v43 }
  0x4b   :  { %627 = vmatpush3.msra.mxu1 %v295_v43  ;;  %580 = vmatprep.subr.mxu0 %v294_v44 }
  0x4c   :  { %612 = vmatprep.subr.mxu1 %v294_v44  ;;  %581 = vmatpush3.msra.mxu0 %v294_v44 }
  0x4d   :  { %628 = vmatpush3.msra.mxu1 %v294_v44  ;;  %582 = vmatprep.subr.mxu0 %v293_v45 }
  0x4e   :  { %613 = vmatprep.subr.mxu1 %v293_v45  ;;  %583 = vmatpush3.msra.mxu0 %v293_v45 }
  0x4f   :  { %629 = vmatpush3.msra.mxu1 %v293_v45  ;;  %584 = vmatprep.subr.mxu0 %v292_v46 }
  0x50   :  { %614 = vmatprep.subr.mxu1 %v292_v46  ;;  %585 = vmatpush3.msra.mxu0 %v292_v46 }
  0x51   :  { %630 = vmatpush3.msra.mxu1 %v292_v46  ;;  %586 = vmatprep.subr.mxu0 %v291_v47 }
  0x52   :  { %615 = vmatprep.subr.mxu1 %v291_v47  ;;  %587 = vmatpush3.msra.mxu0 %v291_v47 }
  0x53   :  { %631 = vmatpush3.msra.mxu1 %v291_v47  ;;  %588 = vmatprep.subr.mxu0 %v290_v48 }
  0x54   :  { %616 = vmatprep.subr.mxu1 %v290_v48  ;;  %589 = vmatpush3.msra.mxu0 %v290_v48 }
  0x55   :  { %632 = vmatpush3.msra.mxu1 %v290_v48  ;;  %590 = vmatprep.subr.mxu0 %v289_v51 }
  0x56   :  { %617 = vmatprep.subr.mxu1 %v289_v51  ;;  %591 = vmatpush3.msra.mxu0 %v289_v51 }
  0x57   :  { %633 = vmatpush3.msra.mxu1 %v289_v51  ;;  %592 = vmatprep.subr.mxu0 %v288_v54 }
  0x58   :  { %618 = vmatprep.subr.mxu1 %v288_v54  ;;  %527 = vmatprep.mubr.msk.f32.mxu0 %vm752_vm1, %v55_v52 }
  0x59   :  { %565 = vmatprep.mubr.f32.mxu1 %v45_v49  ;;  %593 = vmatpush3.msra.mxu0 %v288_v54 }
  0x5a   :  { %634 = vmatpush3.msra.mxu1 %v288_v54  ;;  %528 = vmatmul.mubr.f32.gmra.mxu0 %v57_v55 }
  0x5b   :  { %566 = vmatmul.mubr.f32.gmra.mxu1 %v46_v50  ;;  %594 = vmatprep.subr.mxu0 %v287_v58 }
  0x5c   :  { %619 = vmatprep.subr.mxu1 %v287_v58  ;;  %595 = vmatpush3.msra.mxu0 %v287_v58 }
  0x5d   :  { %635 = vmatpush3.msra.mxu1 %v287_v58  ;;  %596 = vmatprep.subr.mxu0 %v286_v61 }
  0x5e   :  { %620 = vmatprep.subr.mxu1 %v286_v61  ;;  %597 = vmatpush3.msra.mxu0 %v286_v61 }
  0x5f   :  { %636 = vmatpush3.msra.mxu1 %v286_v61  ;;  %598 = vmatprep.subr.mxu0 %v285_v2 }
  0x60   :  { %621 = vmatprep.subr.mxu1 %v285_v2  ;;  %599 = vmatpush3.msra.mxu0 %v285_v2 }
  0x61   :  { %637 = vmatpush3.msra.mxu1 %v285_v2  ;;  %600 = vmatprep.mubr.f32.mxu0 %v272_v3 }
  0x62   :  { %603 = vmatprep.mubr.f32.mxu1 %v277_v4  ;;  %601 = vmatmul.mubr.f32.vlgmr.msra.gmra.mxu0 %v274_v5 }
  0x63   :  { %604 = vmatmul.mubr.f32.vlgmr.msra.gmra.mxu1 %v279_v6 }
  0xfe   :  { %v526_v7 = vpop.f32.mrf.mxu0 }
  0xff   :  { %v564_v8 = vpop.f32.mrf.mxu1 }
 0x100   :  { %v163_v9 = vpop.f32.mrf.mxu0  ;;  %v254_v15 = vadd.f32 %v564_v8, %v526_v7 }
 0x101   :  { %v248_v10 = vpop.f32.mrf.mxu1 }
 0x102   :  { %v249_v20 = vadd.f32 %v248_v10, %v163_v9 }
 0x11a   :  { %v529_v11 = vpop.f32.mrf.mxu0 }
 0x11b   :  { %v567_v12 = vpop.f32.mrf.mxu1 }
 0x11c   :  { %v173_v13 = vpop.f32.mrf.mxu0  ;;  %v264_v16 = vadd.f32 %v567_v12, %v529_v11 }
 0x11d   :  { %v258_v14 = vpop.f32.mrf.mxu1 }
 0x11e   :  { %v259_v21 = vadd.f32 %v258_v14, %v173_v13 }
 0x122   :  { %v602_v17 = vpop.f32.mrf.mxu0 }
 0x123   :  { %v605_v19 = vpop.f32.mrf.mxu1  ;;  %v387_v22 = vadd.f32 %v602_v17, %v254_v15 }
 0x124   :  { %v389_v23 = vadd.f32 %v605_v19, %v264_v16  ;;  %v367_v24 = vpop.f32.mrf.mxu0 }
 0x125   :  { %v377_v25 = vpop.f32.mrf.mxu1  ;;  %v398_v26 = vadd.f32 %v431_v18, %v387_v22  ;;  %v386_v28 = vadd.f32 %v367_v24, %v249_v20 }
 0x126   :  { %v400_v27 = vadd.f32 %v431_v18, %v389_v23  ;;  %v388_v29 = vadd.f32 %v377_v25, %v259_v21 }
 0x127   :  { %v402_v30 = vmax.f32 %v398_v26, 0.0  ;;  %v397_v32 = vadd.f32 %v431_v18, %v386_v28 }
 0x128   :  { %v404_v31 = vmax.f32 %v400_v27, 0.0  ;;  %v399_v33 = vadd.f32 %v431_v18, %v388_v29 }
 0x129   :  { %406 = vst [vmem:[#allocation7 + $0x8] sm:$0xff] %v402_v30  ;;  %v401_v34 = vmax.f32 %v397_v32, 0.0 }
 0x12a   :  { %408 = vst [vmem:[#allocation7 + $0x18] sm:$0xff] %v404_v31  ;;  %v403_v35 = vmax.f32 %v399_v33, 0.0 }
 0x12b   :  { %405 = vst [vmem:[#allocation7] sm:$0xff] %v401_v34 }
 0x12c   :  { %407 = vst [vmem:[#allocation7 + $0x10] sm:$0xff] %v403_v35 }
 0x12d   :  { %694 = shalt.err (!%p691_p0)
}
 0x12e   :  { %420 = dma.vmem_to_hbm [thread:$0]  %s415_s25, 512, %s788_s3, [#allocation4], %s710_s15, %s710_s15, %s711_s16  }
 0x12f   :  { %707 = dma.done.wait [#allocation4], 512  }
 0x130   :  { %708 = vsyncadd [#allocation4], 4294966784 }
 0x131   :  { %424 = vsyncpa [#allocation3], 1 }
 0x132   :  { %425 = vsyncpa [#allocation6], 1 }
 0x133   :  { %426 = vsyncpa [#allocation4], 1 }

</bundles_post_ra>
